<compile_context>
chip_gen: v5e
topology: v5e:2x2
jax: 0.10.0
libtpu: 0.0.40
codegen_flags: <defaults>
</compile_context>

<pallas_src>
import functools
import re

import jax
import jax.numpy as jnp
from jax.experimental import pallas as pl
from jax.experimental.pallas import tpu as pltpu

LANE = 128          # vreg lane width: pad the hidden dim to multiples of 128
SUBLANE_BF16 = 16   # bf16 packs 2 rows per sublane -> batch tiles in multiples of 16


def _round_up(n, m):
    return (n + m - 1) // m * m


def _tpu_generation():
    """Best-effort TPU generation (5 / 6 / 7) from the device kind string."""
    try:
        kind = jax.devices()[0].device_kind
    except Exception:
        return 6
    m = re.search(r"(\d+)", kind)
    return int(m.group(1)) if m else 6


def encoder_kernel(x_ref, w1_ref, b1_ref, w2_ref, b2_ref, o_ref):
    # hidden = sigmoid(x @ W1^T + b1): bf16 MXU operands, f32 accumulation.
    x = x_ref[...].astype(jnp.bfloat16)          # cast in-kernel: raw f32 x from HBM
    h = jnp.dot(x, w1_ref[...], preferred_element_type=jnp.float32)
    h = h + b1_ref[...]                          # (1, e_p) broadcasts over batch rows
    # Sigmoid via tanh: one EUP op instead of a VPU divide; math kept in f32.
    h = 0.5 * jnp.tanh(0.5 * h) + 0.5
    # Padded hidden columns become sigmoid(0)=0.5, but they only ever multiply
    # zero rows of the padded W2^T, so the real output columns are unaffected.
    # TODO(synk): nn.Dropout(p) in train mode needs a PRNG mask
    # (pltpu.prng_seed + pltpu.prng_random_bits) plus 1/(1-p) scaling; this is
    # the eval-mode forward.
    h = h.astype(jnp.bfloat16)                   # bf16 operand for the second MXU pass
    out = jnp.dot(h, w2_ref[...], preferred_element_type=jnp.float32)
    out = out + b2_ref[...]
    o_ref[...] = out.astype(o_ref.dtype)         # real (unpadded) output columns only


def prepare_params(w1, b1, w2, b2):
    """Hoisted per-model prep: transpose weights, pad ONLY the hidden dim E to
    the 128-lane width, and cast the MXU operands to bf16 once.
    The contraction dim (input_len) is left unpadded."""
    E, input_len = w1.shape
    e_p = _round_up(E, LANE)
    w1_t = jnp.zeros((input_len, e_p), jnp.bfloat16).at[:, :E].set(
        w1.T.astype(jnp.bfloat16))
    w2_t = jnp.zeros((e_p, input_len), jnp.bfloat16).at[:E, :].set(
        w2.T.astype(jnp.bfloat16))
    b1_r = jnp.zeros((1, e_p), jnp.float32).at[:, :E].set(b1.astype(jnp.float32))
    b2_r = b2.astype(jnp.float32).reshape(1, input_len)
    return w1_t, b1_r, w2_t, b2_r


@functools.partial(jax.jit, static_argnames=("tile_b",))
def encoder_forward(x, w1_t, b1_r, w2_t, b2_r, *, tile_b=None):
    """x: [B, input_len]; padded/transposed bf16 params from prepare_params."""
    B, input_len = x.shape
    _, e_p = w1_t.shape
    out_dtype = x.dtype
    gen = _tpu_generation()

    # Generation-aware batch tiling:
    #  * up to 4096 rows per tile to amortize the ~0.35 us fixed per-step cost;
    #  * v7x (2 TensorCores): split the REAL batch across >= 2 tiles;
    #  * v5e/v6e (1 TC): one big tile, never an all-padding dummy step.
    if tile_b is None:
        max_tile = 4096
        if gen >= 7 and B > SUBLANE_BF16:
            tile_b = min(max_tile, _round_up(pl.cdiv(B, 2), SUBLANE_BF16))
        else:
            tile_b = min(max_tile, _round_up(B, SUBLANE_BF16))
    assert tile_b % SUBLANE_BF16 == 0
    b_p = _round_up(B, tile_b)
    grid = (b_p // tile_b,)

    # Only pad the batch (rows), and only when needed; x dtype/width untouched.
    if b_p != B:
        x_p = jnp.zeros((b_p, input_len), x.dtype).at[:B].set(x)
    else:
        x_p = x

    # VMEM budget: double-buffered x/out tiles + resident weights/biases +
    # f32/bf16 hidden intermediates, with generous slack.  Cap per generation
    # (v7x: 64 MiB physical / ~32 MiB scoped; v5e/v6e: 128 MiB physical).
    elt = jnp.dtype(x.dtype).itemsize
    per_step = 2 * (tile_b * input_len * elt + tile_b * input_len * 4)
    resident = 2 * ((w1_t.size + w2_t.size) * 2 + (b1_r.size + b2_r.size) * 4)
    hidden = tile_b * e_p * (4 + 2) + tile_b * input_len * 4
    vmem_cap = (30 << 20) if gen >= 7 else (64 << 20)
    vmem_bytes = int(min(max(per_step + resident + hidden + (8 << 20), 16 << 20),
                         vmem_cap))

    out_p = pl.pallas_call(
        encoder_kernel,
        out_shape=jax.ShapeDtypeStruct((b_p, input_len), out_dtype),
        grid_spec=pltpu.PrefetchScalarGridSpec(
            num_scalar_prefetch=0,
            grid=grid,
            in_specs=[
                # x tile: raw dtype, unpadded K (last dim == full array dim).
                pl.BlockSpec((tile_b, input_len), lambda i: (i, 0)),
                pl.BlockSpec((input_len, e_p), lambda i: (0, 0)),  # W1^T (resident)
                pl.BlockSpec((1, e_p), lambda i: (0, 0)),          # b1 (f32)
                pl.BlockSpec((e_p, input_len), lambda i: (0, 0)),  # W2^T (resident)
                pl.BlockSpec((1, input_len), lambda i: (0, 0)),    # b2 (f32)
            ],
            # Real output columns only -> no padded writeback, no post-call
            # column slice (the per-block output slab is contiguous in HBM).
            out_specs=pl.BlockSpec((tile_b, input_len), lambda i: (i, 0)),
        ),
        compiler_params=pltpu.CompilerParams(
            dimension_semantics=("parallel",),
            vmem_limit_bytes=vmem_bytes,
        ),
    )(x_p, w1_t, b1_r, w2_t, b2_r)

    # Only the (possibly) padded batch rows need slicing.
    return out_p if b_p == B else out_p[:B]


def encoder_forward_ref(x, w1, b1, w2, b2):
    h = jax.nn.sigmoid(x @ w1.T + b1)
    return h @ w2.T + b2


if __name__ == "__main__":
    # Small shapes consistent with the module: Encoder(input_len=32, embeddings=64)
    batch, input_len, embeddings = 8, 32, 64

    key = jax.random.PRNGKey(0)
    kx, k1, k2, k3, k4 = jax.random.split(key, 5)

    x = jax.random.normal(kx, (batch, input_len), dtype=jnp.float32)
    # Deterministic parameter init (shapes follow nn.Linear conventions).
    w1 = jax.random.normal(k1, (embeddings, input_len), dtype=jnp.float32) * 0.1
    b1 = jax.random.normal(k2, (embeddings,), dtype=jnp.float32) * 0.1
    w2 = jax.random.normal(k3, (input_len, embeddings), dtype=jnp.float32) * 0.1
    b2 = jax.random.normal(k4, (input_len,), dtype=jnp.float32) * 0.1

    # Hoisted once: transpose / hidden-dim pad / bf16-cast of the weights.
    params = prepare_params(w1, b1, w2, b2)

    out = encoder_forward(x, *params)
    out = jax.block_until_ready(out)

    ref = encoder_forward_ref(x, w1, b1, w2, b2)
    assert out.shape == (batch, input_len)
    # bf16 MXU operands -> looser tolerance vs the pure-f32 reference.
    assert jnp.allclose(out, ref, atol=2e-2, rtol=2e-2), "mismatch vs reference"

    print("KERNEL_OK")
</pallas_src>

<mosaic_0001>
module attributes {stable_mosaic.version = 11 : i64} {
  func.func @encoder_kernel(%arg0: i32, %arg1: memref<16x32xf32, #tpu.memory_space<vmem>>, %arg2: memref<32x128xbf16, #tpu.memory_space<vmem>>, %arg3: memref<1x128xf32, #tpu.memory_space<vmem>>, %arg4: memref<128x32xbf16, #tpu.memory_space<vmem>>, %arg5: memref<1x32xf32, #tpu.memory_space<vmem>>, %arg6: memref<16x32xf32, #tpu.memory_space<vmem>>) attributes {dimension_semantics = [#tpu.dimension_semantics<parallel>], iteration_bounds = array<i64: 1>, scalar_prefetch = 0 : i64, scratch_operands = 0 : i64, tpu.core_type = #tpu.core_type<tc>, window_params = [{transform_indices = @transform_0, window_bounds = array<i64: 16, 32>}, {pipeline_mode = #tpu.pipeline_mode<synchronous>, transform_indices = @transform_1, window_bounds = array<i64: 32, 128>}, {pipeline_mode = #tpu.pipeline_mode<synchronous>, transform_indices = @transform_2, window_bounds = array<i64: 1, 128>}, {pipeline_mode = #tpu.pipeline_mode<synchronous>, transform_indices = @transform_3, window_bounds = array<i64: 128, 32>}, {pipeline_mode = #tpu.pipeline_mode<synchronous>, transform_indices = @transform_4, window_bounds = array<i64: 1, 32>}, {transform_indices = @transform_5, window_bounds = array<i64: 16, 32>}]} {
    %c0 = arith.constant 0 : index
    %c0_0 = arith.constant 0 : index
    %0 = vector.load %arg1[%c0, %c0_0] : memref<16x32xf32, #tpu.memory_space<vmem>>, vector<16x32xf32>
    %1 = arith.truncf %0 : vector<16x32xf32> to vector<16x32xbf16>
    %c0_1 = arith.constant 0 : index
    %c0_2 = arith.constant 0 : index
    %2 = vector.load %arg2[%c0_1, %c0_2] : memref<32x128xbf16, #tpu.memory_space<vmem>>, vector<32x128xbf16>
    %cst = arith.constant dense<0.000000e+00> : vector<16x128xf32>
    %3 = tpu.matmul %1, %2, %cst {dimension_numbers = #tpu.dot_dimension_numbers<[1], [0], [0], [1], [0, 0, 1, 1], [], []>} : vector<16x32xbf16>, vector<32x128xbf16>, vector<16x128xf32> -> vector<16x128xf32>
    %c0_3 = arith.constant 0 : index
    %c0_4 = arith.constant 0 : index
    %4 = vector.load %arg3[%c0_3, %c0_4] : memref<1x128xf32, #tpu.memory_space<vmem>>, vector<1x128xf32>
    %5 = vector.broadcast %4 : vector<1x128xf32> to vector<16x128xf32>
    %6 = arith.addf %3, %5 : vector<16x128xf32>
    %cst_5 = arith.constant 5.000000e-01 : f32
    %7 = vector.broadcast %cst_5 : f32 to vector<16x128xf32>
    %8 = arith.mulf %7, %6 : vector<16x128xf32>
    %9 = math.tanh %8 : vector<16x128xf32>
    %cst_6 = arith.constant 5.000000e-01 : f32
    %10 = vector.broadcast %cst_6 : f32 to vector<16x128xf32>
    %11 = arith.mulf %10, %9 : vector<16x128xf32>
    %cst_7 = arith.constant 5.000000e-01 : f32
    %12 = vector.broadcast %cst_7 : f32 to vector<16x128xf32>
    %13 = arith.addf %11, %12 : vector<16x128xf32>
    %14 = arith.truncf %13 : vector<16x128xf32> to vector<16x128xbf16>
    %c0_8 = arith.constant 0 : index
    %c0_9 = arith.constant 0 : index
    %15 = vector.load %arg4[%c0_8, %c0_9] : memref<128x32xbf16, #tpu.memory_space<vmem>>, vector<128x32xbf16>
    %cst_10 = arith.constant dense<0.000000e+00> : vector<16x32xf32>
    %16 = tpu.matmul %14, %15, %cst_10 {dimension_numbers = #tpu.dot_dimension_numbers<[1], [0], [0], [1], [0, 0, 1, 1], [], []>} : vector<16x128xbf16>, vector<128x32xbf16>, vector<16x32xf32> -> vector<16x32xf32>
    %c0_11 = arith.constant 0 : index
    %c0_12 = arith.constant 0 : index
    %17 = vector.load %arg5[%c0_11, %c0_12] : memref<1x32xf32, #tpu.memory_space<vmem>>, vector<1x32xf32>
    %18 = vector.broadcast %17 : vector<1x32xf32> to vector<16x32xf32>
    %19 = arith.addf %16, %18 : vector<16x32xf32>
    %c0_13 = arith.constant 0 : index
    %c0_14 = arith.constant 0 : index
    %20 = vector.load %arg6[%c0_13, %c0_14] : memref<16x32xf32, #tpu.memory_space<vmem>>, vector<16x32xf32>
    tpu.vector_store %arg6[%c0_13, %c0_14], %19 {strides = array<i32>} : memref<16x32xf32, #tpu.memory_space<vmem>>, vector<16x32xf32>,
    return
  }
  func.func @transform_0(%arg0: i32) -> (i32, i32) {
    %c0_i32 = arith.constant 0 : i32
    %c0_i32_0 = arith.constant 0 : i32
    return %arg0, %c0_i32 : i32, i32
  }
  func.func @transform_1(%arg0: i32) -> (i32, i32) {
    %c0_i32 = arith.constant 0 : i32
    %c0_i32_0 = arith.constant 0 : i32
    %c0_i32_1 = arith.constant 0 : i32
    return %c0_i32, %c0_i32_0 : i32, i32
  }
  func.func @transform_2(%arg0: i32) -> (i32, i32) {
    %c0_i32 = arith.constant 0 : i32
    %c0_i32_0 = arith.constant 0 : i32
    %c0_i32_1 = arith.constant 0 : i32
    return %c0_i32, %c0_i32_0 : i32, i32
  }
  func.func @transform_3(%arg0: i32) -> (i32, i32) {
    %c0_i32 = arith.constant 0 : i32
    %c0_i32_0 = arith.constant 0 : i32
    %c0_i32_1 = arith.constant 0 : i32
    return %c0_i32, %c0_i32_0 : i32, i32
  }
  func.func @transform_4(%arg0: i32) -> (i32, i32) {
    %c0_i32 = arith.constant 0 : i32
    %c0_i32_0 = arith.constant 0 : i32
    %c0_i32_1 = arith.constant 0 : i32
    return %c0_i32, %c0_i32_0 : i32, i32
  }
  func.func @transform_5(%arg0: i32) -> (i32, i32) {
    %c0_i32 = arith.constant 0 : i32
    %c0_i32_0 = arith.constant 0 : i32
    return %arg0, %c0_i32 : i32, i32
  }
}

</mosaic_0001>

<bundles_post_ra>
// kernel: encoder_forward.1
= control target key start
LH: loop header
LB: loop body
LE: loop exit
PB: predicated region body
PF: predicated region fallthrough
CT: control target
= control target key end

     0   :  { %vm44_vm0 = vcmask 261120   ;;  %s297_s1 = inlined_call_operand.vmem [shape: bf16[32,128], index: 1, kind: input, shape index: {}]   ;;  %s298_s0 = inlined_call_operand.vmem [shape: f32[16,32], index: 0, kind: input, shape index: {}]   ;;  %s299_s3 = inlined_call_operand.vmem [shape: bf16[128,32], index: 3, kind: input, shape index: {}]   ;;  %s300_s2 = inlined_call_operand.vmem [shape: f32[1,128], index: 2, kind: input, shape index: {}]   ;;  %s301_s4 = inlined_call_operand.vmem [shape: f32[1,32], index: 4, kind: input, shape index: {}]   ;;  %s302_s5 = inlined_call_operand.vmem [shape: f32[16,32], index: 5, kind: output, shape index: {}]  }
   0x1   :  { %v201_v0 = vld [vmem:[%s297_s1 + $0x8] sm:$0xff]  ;;  %v200_v1 = vld [vmem:[%s297_s1] sm:$0xff]  ;;  %v209_v2 = vld [vmem:[%s299_s3 + $0x38] sm:$0xff] }
   0x2   :  { %54 = vmatpush.bf16.msra.mxu0 %v201_v0  ;;  %v21_v3 = vld [vmem:[%s298_s0] sm:$0xff]  ;;  %v22_v4 = vld [vmem:[%s298_s0 + $0x8] sm:$0xff]  ;;  %139 = vmatpush.bf16.msra.mxu1 %v209_v2  ;;  %v208_v5 = vld [vmem:[%s299_s3 + $0x30] sm:$0xff] }
   0x3   :  { %v23_v6 = vpack.c.bf16 %v22_v4, %v21_v3  ;;  %v207_v7 = vld [vmem:[%s299_s3 + $0x28] sm:$0xff]  ;;  %v206_v8 = vld [vmem:[%s299_s3 + $0x20] sm:$0xff]  ;;  %v205_v9 = vld [vmem:[%s299_s3 + $0x18] sm:$0xff] }
   0x4   :  { %v204_v10 = vld [vmem:[%s299_s3 + $0x10] sm:$0xff]  ;;  %v203_v11 = vld [vmem:[%s299_s3 + $0x8] sm:$0xff]  ;;  %v202_v12 = vld [vmem:[%s299_s3] sm:$0xff] }
   0x5   :  { %v210_v13 = vld [vmem:[%s300_s2] ss:$0 sm:$0xff] }
   0x6   :  { %55 = vmatpush.bf16.msra.mxu0 %v200_v1  ;;  %140 = vmatpush.bf16.msra.mxu1 %v208_v5  ;;  %v211_v27 = vld [vmem:[%s301_s4] ss:$0 sm:$0xff] }
   0x9   :  { %167 = vmatmul.msk.bf16.vlgmr.msra.gmra.mxu0 %vm44_vm0, %v23_v6 }
   0xa   :  { %141 = vmatpush.bf16.msra.mxu1 %v207_v7 }
   0xe   :  { %142 = vmatpush.bf16.msra.mxu1 %v206_v8 }
  0x12   :  { %143 = vmatpush.bf16.msra.mxu1 %v205_v9 }
  0x16   :  { %144 = vmatpush.bf16.msra.mxu1 %v204_v10 }
  0x1a   :  { %145 = vmatpush.bf16.msra.mxu1 %v203_v11 }
  0x1e   :  { %146 = vmatpush.bf16.msra.mxu1 %v202_v12 }
  0x86   :  { %v57_v14 = vpop.f32.mrf.mxu0 }
  0x87   :  { %v58_v15 = vadd.f32 %v210_v13, %v57_v14 }
  0x89   :  { %v62_v16 = vmul.f32 0.5, %v58_v15 }
  0x8b   :  { %212 = vtanh.f32 %v62_v16 }
  0x8e   :  { %v59_v17 = vpop.f32.mrf.mxu0 }
  0x8f   :  { %v60_v18 = vadd.f32 %v210_v13, %v59_v17 }
  0x91   :  { %v63_v19 = vmul.f32 0.5, %v60_v18  ;;  %v213_v20 = vpop.eup %212 }
  0x92   :  { %v66_v21 = vmul.f32 0.5, %v213_v20 }
  0x93   :  { %214 = vtanh.f32 %v63_v19 }
  0x94   :  { %v68_v24 = vadd.f32 0.5, %v66_v21 }
  0x99   :  { %v215_v22 = vpop.eup %214 }
  0x9a   :  { %v67_v23 = vmul.f32 0.5, %v215_v22 }
  0x9c   :  { %v69_v25 = vadd.f32 0.5, %v67_v23 }
  0x9e   :  { %v70_v26 = vpack.c.bf16 %v69_v25, %v68_v24 }
  0xa0   :  { %147 = vmatmul.bf16.vlgmr.msra.gmra.mxu1 %v70_v26 }
 0x11d   :  { %v148_v28 = vpop.f32.mrf.mxu1 }
 0x11e   :  { %v149_v29 = vadd.f32 %v211_v27, %v148_v28 }
 0x120   :  { %153 = vst.msk [vmem:[%s302_s5] sm:$0xff] %vm44_vm0, %v149_v29 }
 0x125   :  { %v150_v30 = vpop.f32.mrf.mxu1 }
 0x126   :  { %v151_v31 = vadd.f32 %v211_v27, %v150_v30 }
 0x128   :  { %154 = vst.msk [vmem:[%s302_s5 + $0x8] sm:$0xff] %vm44_vm0, %v151_v31 }

</bundles_post_ra>
